<compile_context>
chip_gen: v5e
topology: v5e:2x2
jax: 0.10.0
libtpu: 0.0.40
codegen_flags: <defaults>
</compile_context>

<pallas_src>
import functools

import jax
import jax.numpy as jnp
from jax.experimental import pallas as pl
from jax.experimental.pallas import tpu as pltpu

_OUT_LANES = 128  # lane-dense output width (bayes5 padded from dim_x to 128)


def _round_up(x, m):
    return ((x + m - 1) // m) * m


# ---------------------------------------------------------------------------
# Shared math: fused ProcessModelAction MLP (+ folded residual), bf16/f32.
# Used by the Pallas kernel, the small-N XLA fast path, and the tight check.
# ---------------------------------------------------------------------------
def _mlp_math(xa_bf, W1, B1, W2, B2, W3, B3, W4, B4, W5A, W5R, B5):
    """xa_bf: [T, dim_x+dim_a] bf16  ->  [T, 128] f32 (cols >= dim_x are 0)."""

    def layer(x_bf, w, b):
        y = jnp.dot(x_bf, w, preferred_element_type=jnp.float32) + b
        return jnp.maximum(y, 0.0).astype(jnp.bfloat16)

    h = layer(xa_bf, W1, B1)                       # [T,128] = [relu(x1)|relu(y1)]
    h = layer(h, W2, B2)                           # [T,256]
    h = layer(h, W3, B3)                           # [T,128] = cat([x3, y3])
    merge = (jnp.dot(h, W4, preferred_element_type=jnp.float32)
             + B4).astype(jnp.bfloat16)            # [T,64] (no ReLU, as in PyTorch)
    # bayes5 (padded to 128 lanes) + residual folded in via identity block.
    out = (jnp.dot(merge, W5A, preferred_element_type=jnp.float32)
           + jnp.dot(xa_bf, W5R, preferred_element_type=jnp.float32)
           + B5)                                   # [T,128] f32
    return out


# ---------------------------------------------------------------------------
# Pallas kernel: one row-tile of the fused MLP per grid step
# ---------------------------------------------------------------------------
def _mlp_kernel(xa_ref,                            # [T, dim_x+dim_a] bf16
                w1, b1, w2, b2, w3, b3, w4, b4,    # resident fused weights
                w5a, w5r, b5,
                out_ref):                          # [T, 128] f32 (lane-dense)
    out_ref[...] = _mlp_math(
        xa_ref[...], w1[...], b1[...], w2[...], b2[...], w3[...], b3[...],
        w4[...], b4[...], w5a[...], w5r[...], b5[...])


# ---------------------------------------------------------------------------
# Jitted wrapper
# ---------------------------------------------------------------------------
@functools.partial(jax.jit, static_argnames=("tile_n", "min_pallas_rows"))
def forward_model_stable(states, action, fused_params, *,
                         tile_n=256, min_pallas_rows=512):
    state_old, _m_state = states                   # m_state unused (as in PyTorch)
    bs, k, dim_x = state_old.shape
    dim_a = action.shape[-1]
    N = bs * k
    dim_in = dim_x + dim_a

    # pack [state | action] rows, bf16 once (matmul operand dtype)
    xa = jnp.concatenate(
        [state_old.reshape(N, dim_x), action.reshape(N, dim_a)], axis=1
    ).astype(jnp.bfloat16)

    if N < min_pallas_rows:
        # Tiny-N fast path: pallas_call launch/DMA setup dominates; let XLA fuse.
        out128 = _mlp_math(xa, *fused_params)
    else:
        # Balanced row tiles: minimal padding; >= 2 tiles so the "parallel"
        # axis can shard across both TensorCores on v7x.
        num_tiles = max(2, -(-N // tile_n))
        tile = _round_up(-(-N // num_tiles), 8)
        n_pad = tile * num_tiles
        if n_pad != N:
            xa = jnp.pad(xa, ((0, n_pad - N), (0, 0)))

        def resident(arr):                         # full-array, VMEM-resident block
            return pl.BlockSpec(arr.shape, lambda i: (0, 0))

        out128 = pl.pallas_call(
            _mlp_kernel,
            out_shape=jax.ShapeDtypeStruct((n_pad, _OUT_LANES), jnp.float32),
            grid=(num_tiles,),
            in_specs=[pl.BlockSpec((tile, dim_in), lambda i: (i, 0))]
                     + [resident(a) for a in fused_params],
            out_specs=pl.BlockSpec((tile, _OUT_LANES), lambda i: (i, 0)),
            compiler_params=pltpu.CompilerParams(
                dimension_semantics=("parallel",)),
        )(xa, *fused_params)

    state_pred = out128[:N, :dim_x].reshape(bs, k, dim_x)
    # torch.mean(state_pred, axis=1) -> rearrange 'bs (k dim) -> bs k dim', k=1
    m_state_pred = jnp.mean(state_pred, axis=1, keepdims=True)
    return state_pred, m_state_pred


# ---------------------------------------------------------------------------
# Parameter init: raw per-layer mean weights + fused block-diagonal packing
# ---------------------------------------------------------------------------
def init_params(key, dim_x, dim_a):
    sizes = [
        (dim_x, 64), (64, 128), (128, 64),      # bayes1..3   (state branch)
        (dim_a, 64), (64, 128), (128, 64),      # bayes_a1..3 (action branch)
        (128, 64),                              # bayes4 (acts on cat([x, y]))
        (64, dim_x),                            # bayes5
    ]
    raw = []
    for fan_in, fan_out in sizes:
        key, kw, kb = jax.random.split(key, 3)
        w = jax.random.normal(kw, (fan_in, fan_out), jnp.float32) / jnp.sqrt(
            jnp.float32(fan_in))
        b = jax.random.normal(kb, (1, fan_out), jnp.float32) * 0.01
        raw.append((w, b))

    (w1, b1), (w2, b2), (w3, b3), (wa1, ba1), (wa2, ba2), (wa3, ba3), \
        (w4, b4), (w5, b5) = raw

    def blockdiag(wx, wy):
        top = jnp.concatenate(
            [wx, jnp.zeros((wx.shape[0], wy.shape[1]), jnp.float32)], axis=1)
        bot = jnp.concatenate(
            [jnp.zeros((wy.shape[0], wx.shape[1]), jnp.float32), wy], axis=1)
        return jnp.concatenate([top, bot], axis=0)

    dim_in = dim_x + dim_a
    W1 = blockdiag(w1, wa1); B1 = jnp.concatenate([b1, ba1], axis=1)  # [din,128]
    W2 = blockdiag(w2, wa2); B2 = jnp.concatenate([b2, ba2], axis=1)  # [128,256]
    W3 = blockdiag(w3, wa3); B3 = jnp.concatenate([b3, ba3], axis=1)  # [256,128]

    # bayes5 padded to 128 output lanes (lane-dense store); residual
    # (last_state + update) folded in as an identity block acting on xa.
    W5A = jnp.zeros((64, _OUT_LANES), jnp.float32).at[:, :dim_x].set(w5)
    W5R = jnp.zeros((dim_in, _OUT_LANES), jnp.float32).at[
        :dim_x, :dim_x].set(jnp.eye(dim_x, dtype=jnp.float32))
    B5 = jnp.zeros((1, _OUT_LANES), jnp.float32).at[:, :dim_x].set(b5)

    bf = lambda a: a.astype(jnp.bfloat16)
    fused = (bf(W1), B1, bf(W2), B2, bf(W3), B3, bf(w4), b4,
             bf(W5A), bf(W5R), B5)
    raw_flat = (w1, b1, w2, b2, w3, b3, wa1, ba1, wa2, ba2, wa3, ba3,
                w4, b4, w5, b5)
    return fused, raw_flat


# ---------------------------------------------------------------------------
# Reference: original PyTorch module semantics (mean-weight path) in f32
# ---------------------------------------------------------------------------
def _reference_f32(states, action, raw):
    state_old, _ = states
    bs, k, dim_x = state_old.shape
    dim_a = action.shape[-1]
    s = state_old.reshape(bs * k, dim_x)
    a = action.reshape(bs * k, dim_a)
    (w1, b1, w2, b2, w3, b3, wa1, ba1, wa2, ba2, wa3, ba3,
     w4, b4, w5, b5) = raw
    relu = lambda z: jnp.maximum(z, 0.0)
    x = relu(s @ w1 + b1); x = relu(x @ w2 + b2); x = relu(x @ w3 + b3)
    y = relu(a @ wa1 + ba1); y = relu(y @ wa2 + ba2); y = relu(y @ wa3 + ba3)
    merge = jnp.concatenate([x, y], axis=1) @ w4 + b4
    update = merge @ w5 + b5
    state = s + update
    sp = state.reshape(bs, k, dim_x)
    return sp, jnp.mean(sp, axis=1, keepdims=True)


if __name__ == "__main__":
    bs, num_ensemble, dim_x, dim_a = 2, 16, 8, 4

    key = jax.random.PRNGKey(0)
    key, k1, k2, k3 = jax.random.split(key, 4)
    state_old = jax.random.normal(k1, (bs, num_ensemble, dim_x), jnp.float32)
    m_state = jax.random.normal(k2, (bs, 1, dim_x), jnp.float32)  # unused by fwd
    action = jax.random.normal(k3, (bs, num_ensemble, dim_a), jnp.float32)

    fused_params, raw_params = init_params(key, dim_x, dim_a)

    # Force the Pallas path at this small test size (production default routes
    # tiny N to the fused XLA fast path).
    state_pred, m_state_pred = forward_model_stable(
        (state_old, m_state), action, fused_params, min_pallas_rows=1)
    jax.block_until_ready((state_pred, m_state_pred))

    assert state_pred.shape == (bs, num_ensemble, dim_x)
    assert m_state_pred.shape == (bs, 1, dim_x)

    # Tight check: identical bf16/f32 arithmetic in plain JAX.
    xa = jnp.concatenate(
        [state_old.reshape(-1, dim_x), action.reshape(-1, dim_a)], axis=1)
    ref128 = _mlp_math(xa.astype(jnp.bfloat16), *fused_params)
    ref_sp = ref128[:, :dim_x].reshape(bs, num_ensemble, dim_x)
    ref_mp = jnp.mean(ref_sp, axis=1, keepdims=True)
    assert jnp.allclose(state_pred, ref_sp, atol=2e-2, rtol=2e-2)
    assert jnp.allclose(m_state_pred, ref_mp, atol=2e-2, rtol=2e-2)

    # Loose check: original module semantics in full f32 (bf16 rounding slack).
    ref32_sp, ref32_mp = _reference_f32((state_old, m_state), action, raw_params)
    assert jnp.allclose(state_pred, ref32_sp, atol=0.25, rtol=0.1)
    assert jnp.allclose(m_state_pred, ref32_mp, atol=0.25, rtol=0.1)

    print("KERNEL_OK")
</pallas_src>

<mosaic_0001>
module attributes {stable_mosaic.version = 11 : i64} {
  func.func @_mlp_kernel(%arg0: i32, %arg1: memref<16x12xbf16, #tpu.memory_space<vmem>>, %arg2: memref<12x128xbf16, #tpu.memory_space<vmem>>, %arg3: memref<1x128xf32, #tpu.memory_space<vmem>>, %arg4: memref<128x256xbf16, #tpu.memory_space<vmem>>, %arg5: memref<1x256xf32, #tpu.memory_space<vmem>>, %arg6: memref<256x128xbf16, #tpu.memory_space<vmem>>, %arg7: memref<1x128xf32, #tpu.memory_space<vmem>>, %arg8: memref<128x64xbf16, #tpu.memory_space<vmem>>, %arg9: memref<1x64xf32, #tpu.memory_space<vmem>>, %arg10: memref<64x128xbf16, #tpu.memory_space<vmem>>, %arg11: memref<12x128xbf16, #tpu.memory_space<vmem>>, %arg12: memref<1x128xf32, #tpu.memory_space<vmem>>, %arg13: memref<16x128xf32, #tpu.memory_space<vmem>>) attributes {dimension_semantics = [#tpu.dimension_semantics<parallel>], iteration_bounds = array<i64: 2>, scalar_prefetch = 0 : i64, scratch_operands = 0 : i64, tpu.core_type = #tpu.core_type<tc>, window_params = [{transform_indices = @transform_0, window_bounds = array<i64: 16, 12>}, {pipeline_mode = #tpu.pipeline_mode<synchronous>, transform_indices = @transform_1, window_bounds = array<i64: 12, 128>}, {pipeline_mode = #tpu.pipeline_mode<synchronous>, transform_indices = @transform_2, window_bounds = array<i64: 1, 128>}, {pipeline_mode = #tpu.pipeline_mode<synchronous>, transform_indices = @transform_3, window_bounds = array<i64: 128, 256>}, {pipeline_mode = #tpu.pipeline_mode<synchronous>, transform_indices = @transform_4, window_bounds = array<i64: 1, 256>}, {pipeline_mode = #tpu.pipeline_mode<synchronous>, transform_indices = @transform_5, window_bounds = array<i64: 256, 128>}, {pipeline_mode = #tpu.pipeline_mode<synchronous>, transform_indices = @transform_6, window_bounds = array<i64: 1, 128>}, {pipeline_mode = #tpu.pipeline_mode<synchronous>, transform_indices = @transform_7, window_bounds = array<i64: 128, 64>}, {pipeline_mode = #tpu.pipeline_mode<synchronous>, transform_indices = @transform_8, window_bounds = array<i64: 1, 64>}, {pipeline_mode = #tpu.pipeline_mode<synchronous>, transform_indices = @transform_9, window_bounds = array<i64: 64, 128>}, {pipeline_mode = #tpu.pipeline_mode<synchronous>, transform_indices = @transform_10, window_bounds = array<i64: 12, 128>}, {pipeline_mode = #tpu.pipeline_mode<synchronous>, transform_indices = @transform_11, window_bounds = array<i64: 1, 128>}, {transform_indices = @transform_12, window_bounds = array<i64: 16, 128>}]} {
    %c0 = arith.constant 0 : index
    %c0_0 = arith.constant 0 : index
    %0 = vector.load %arg1[%c0, %c0_0] : memref<16x12xbf16, #tpu.memory_space<vmem>>, vector<16x12xbf16>
    %c0_1 = arith.constant 0 : index
    %c0_2 = arith.constant 0 : index
    %1 = vector.load %arg2[%c0_1, %c0_2] : memref<12x128xbf16, #tpu.memory_space<vmem>>, vector<12x128xbf16>
    %c0_3 = arith.constant 0 : index
    %c0_4 = arith.constant 0 : index
    %2 = vector.load %arg3[%c0_3, %c0_4] : memref<1x128xf32, #tpu.memory_space<vmem>>, vector<1x128xf32>
    %c0_5 = arith.constant 0 : index
    %c0_6 = arith.constant 0 : index
    %3 = vector.load %arg4[%c0_5, %c0_6] : memref<128x256xbf16, #tpu.memory_space<vmem>>, vector<128x256xbf16>
    %c0_7 = arith.constant 0 : index
    %c0_8 = arith.constant 0 : index
    %4 = vector.load %arg5[%c0_7, %c0_8] : memref<1x256xf32, #tpu.memory_space<vmem>>, vector<1x256xf32>
    %c0_9 = arith.constant 0 : index
    %c0_10 = arith.constant 0 : index
    %5 = vector.load %arg6[%c0_9, %c0_10] : memref<256x128xbf16, #tpu.memory_space<vmem>>, vector<256x128xbf16>
    %c0_11 = arith.constant 0 : index
    %c0_12 = arith.constant 0 : index
    %6 = vector.load %arg7[%c0_11, %c0_12] : memref<1x128xf32, #tpu.memory_space<vmem>>, vector<1x128xf32>
    %c0_13 = arith.constant 0 : index
    %c0_14 = arith.constant 0 : index
    %7 = vector.load %arg8[%c0_13, %c0_14] : memref<128x64xbf16, #tpu.memory_space<vmem>>, vector<128x64xbf16>
    %c0_15 = arith.constant 0 : index
    %c0_16 = arith.constant 0 : index
    %8 = vector.load %arg9[%c0_15, %c0_16] : memref<1x64xf32, #tpu.memory_space<vmem>>, vector<1x64xf32>
    %c0_17 = arith.constant 0 : index
    %c0_18 = arith.constant 0 : index
    %9 = vector.load %arg10[%c0_17, %c0_18] : memref<64x128xbf16, #tpu.memory_space<vmem>>, vector<64x128xbf16>
    %c0_19 = arith.constant 0 : index
    %c0_20 = arith.constant 0 : index
    %10 = vector.load %arg11[%c0_19, %c0_20] : memref<12x128xbf16, #tpu.memory_space<vmem>>, vector<12x128xbf16>
    %c0_21 = arith.constant 0 : index
    %c0_22 = arith.constant 0 : index
    %11 = vector.load %arg12[%c0_21, %c0_22] : memref<1x128xf32, #tpu.memory_space<vmem>>, vector<1x128xf32>
    %cst = arith.constant dense<0.000000e+00> : vector<16x128xf32>
    %12 = tpu.matmul %0, %1, %cst {dimension_numbers = #tpu.dot_dimension_numbers<[1], [0], [0], [1], [0, 0, 1, 1], [], []>} : vector<16x12xbf16>, vector<12x128xbf16>, vector<16x128xf32> -> vector<16x128xf32>
    %13 = vector.broadcast %2 : vector<1x128xf32> to vector<16x128xf32>
    %14 = arith.addf %12, %13 : vector<16x128xf32>
    %cst_23 = arith.constant 0.000000e+00 : f32
    %15 = vector.broadcast %cst_23 : f32 to vector<16x128xf32>
    %16 = arith.maximumf %14, %15 : vector<16x128xf32>
    %17 = arith.truncf %16 : vector<16x128xf32> to vector<16x128xbf16>
    %cst_24 = arith.constant dense<0.000000e+00> : vector<16x256xf32>
    %18 = tpu.matmul %17, %3, %cst_24 {dimension_numbers = #tpu.dot_dimension_numbers<[1], [0], [0], [1], [0, 0, 1, 1], [], []>} : vector<16x128xbf16>, vector<128x256xbf16>, vector<16x256xf32> -> vector<16x256xf32>
    %19 = vector.broadcast %4 : vector<1x256xf32> to vector<16x256xf32>
    %20 = arith.addf %18, %19 : vector<16x256xf32>
    %cst_25 = arith.constant 0.000000e+00 : f32
    %21 = vector.broadcast %cst_25 : f32 to vector<16x256xf32>
    %22 = arith.maximumf %20, %21 : vector<16x256xf32>
    %23 = arith.truncf %22 : vector<16x256xf32> to vector<16x256xbf16>
    %cst_26 = arith.constant dense<0.000000e+00> : vector<16x128xf32>
    %24 = tpu.matmul %23, %5, %cst_26 {dimension_numbers = #tpu.dot_dimension_numbers<[1], [0], [0], [1], [0, 0, 1, 1], [], []>} : vector<16x256xbf16>, vector<256x128xbf16>, vector<16x128xf32> -> vector<16x128xf32>
    %25 = vector.broadcast %6 : vector<1x128xf32> to vector<16x128xf32>
    %26 = arith.addf %24, %25 : vector<16x128xf32>
    %cst_27 = arith.constant 0.000000e+00 : f32
    %27 = vector.broadcast %cst_27 : f32 to vector<16x128xf32>
    %28 = arith.maximumf %26, %27 : vector<16x128xf32>
    %29 = arith.truncf %28 : vector<16x128xf32> to vector<16x128xbf16>
    %cst_28 = arith.constant dense<0.000000e+00> : vector<16x64xf32>
    %30 = tpu.matmul %29, %7, %cst_28 {dimension_numbers = #tpu.dot_dimension_numbers<[1], [0], [0], [1], [0, 0, 1, 1], [], []>} : vector<16x128xbf16>, vector<128x64xbf16>, vector<16x64xf32> -> vector<16x64xf32>
    %31 = vector.broadcast %8 : vector<1x64xf32> to vector<16x64xf32>
    %32 = arith.addf %30, %31 : vector<16x64xf32>
    %33 = arith.truncf %32 : vector<16x64xf32> to vector<16x64xbf16>
    %cst_29 = arith.constant dense<0.000000e+00> : vector<16x128xf32>
    %34 = tpu.matmul %33, %9, %cst_29 {dimension_numbers = #tpu.dot_dimension_numbers<[1], [0], [0], [1], [0, 0, 1, 1], [], []>} : vector<16x64xbf16>, vector<64x128xbf16>, vector<16x128xf32> -> vector<16x128xf32>
    %cst_30 = arith.constant dense<0.000000e+00> : vector<16x128xf32>
    %35 = tpu.matmul %0, %10, %cst_30 {dimension_numbers = #tpu.dot_dimension_numbers<[1], [0], [0], [1], [0, 0, 1, 1], [], []>} : vector<16x12xbf16>, vector<12x128xbf16>, vector<16x128xf32> -> vector<16x128xf32>
    %36 = arith.addf %34, %35 : vector<16x128xf32>
    %37 = vector.broadcast %11 : vector<1x128xf32> to vector<16x128xf32>
    %38 = arith.addf %36, %37 : vector<16x128xf32>
    %c0_31 = arith.constant 0 : index
    %c0_32 = arith.constant 0 : index
    %39 = vector.load %arg13[%c0_31, %c0_32] : memref<16x128xf32, #tpu.memory_space<vmem>>, vector<16x128xf32>
    tpu.vector_store %arg13[%c0_31, %c0_32], %38 {strides = array<i32>} : memref<16x128xf32, #tpu.memory_space<vmem>>, vector<16x128xf32>,
    return
  }
  func.func @transform_0(%arg0: i32) -> (i32, i32) {
    %c0_i32 = arith.constant 0 : i32
    %c0_i32_0 = arith.constant 0 : i32
    return %arg0, %c0_i32 : i32, i32
  }
  func.func @transform_1(%arg0: i32) -> (i32, i32) {
    %c0_i32 = arith.constant 0 : i32
    %c0_i32_0 = arith.constant 0 : i32
    %c0_i32_1 = arith.constant 0 : i32
    return %c0_i32, %c0_i32_0 : i32, i32
  }
  func.func @transform_2(%arg0: i32) -> (i32, i32) {
    %c0_i32 = arith.constant 0 : i32
    %c0_i32_0 = arith.constant 0 : i32
    %c0_i32_1 = arith.constant 0 : i32
    return %c0_i32, %c0_i32_0 : i32, i32
  }
  func.func @transform_3(%arg0: i32) -> (i32, i32) {
    %c0_i32 = arith.constant 0 : i32
    %c0_i32_0 = arith.constant 0 : i32
    %c0_i32_1 = arith.constant 0 : i32
    return %c0_i32, %c0_i32_0 : i32, i32
  }
  func.func @transform_4(%arg0: i32) -> (i32, i32) {
    %c0_i32 = arith.constant 0 : i32
    %c0_i32_0 = arith.constant 0 : i32
    %c0_i32_1 = arith.constant 0 : i32
    return %c0_i32, %c0_i32_0 : i32, i32
  }
  func.func @transform_5(%arg0: i32) -> (i32, i32) {
    %c0_i32 = arith.constant 0 : i32
    %c0_i32_0 = arith.constant 0 : i32
    %c0_i32_1 = arith.constant 0 : i32
    return %c0_i32, %c0_i32_0 : i32, i32
  }
  func.func @transform_6(%arg0: i32) -> (i32, i32) {
    %c0_i32 = arith.constant 0 : i32
    %c0_i32_0 = arith.constant 0 : i32
    %c0_i32_1 = arith.constant 0 : i32
    return %c0_i32, %c0_i32_0 : i32, i32
  }
  func.func @transform_7(%arg0: i32) -> (i32, i32) {
    %c0_i32 = arith.constant 0 : i32
    %c0_i32_0 = arith.constant 0 : i32
    %c0_i32_1 = arith.constant 0 : i32
    return %c0_i32, %c0_i32_0 : i32, i32
  }
  func.func @transform_8(%arg0: i32) -> (i32, i32) {
    %c0_i32 = arith.constant 0 : i32
    %c0_i32_0 = arith.constant 0 : i32
    %c0_i32_1 = arith.constant 0 : i32
    return %c0_i32, %c0_i32_0 : i32, i32
  }
  func.func @transform_9(%arg0: i32) -> (i32, i32) {
    %c0_i32 = arith.constant 0 : i32
    %c0_i32_0 = arith.constant 0 : i32
    %c0_i32_1 = arith.constant 0 : i32
    return %c0_i32, %c0_i32_0 : i32, i32
  }
  func.func @transform_10(%arg0: i32) -> (i32, i32) {
    %c0_i32 = arith.constant 0 : i32
    %c0_i32_0 = arith.constant 0 : i32
    %c0_i32_1 = arith.constant 0 : i32
    return %c0_i32, %c0_i32_0 : i32, i32
  }
  func.func @transform_11(%arg0: i32) -> (i32, i32) {
    %c0_i32 = arith.constant 0 : i32
    %c0_i32_0 = arith.constant 0 : i32
    %c0_i32_1 = arith.constant 0 : i32
    return %c0_i32, %c0_i32_0 : i32, i32
  }
  func.func @transform_12(%arg0: i32) -> (i32, i32) {
    %c0_i32 = arith.constant 0 : i32
    %c0_i32_0 = arith.constant 0 : i32
    return %arg0, %c0_i32 : i32, i32
  }
}

</mosaic_0001>

<bundles_post_ra>
// kernel: forward_model_stable.1
= control target key start
LH: loop header
LB: loop body
LE: loop exit
PB: predicated region body
PF: predicated region fallthrough
CT: control target
= control target key end

     0   :  { %17 = vsyncpa [#allocation3], 0  ;;  %s1396_s21 = smov 0   ;;  %s1587_s0 = inlined_call_operand.vmem [shape: bf16[32,12], index: 0, kind: input, shape index: {}]   ;;  %s1588_s1 = inlined_call_operand.vmem [shape: bf16[12,128], index: 1, kind: input, shape index: {}]   ;;  %s1589_s2 = inlined_call_operand.vmem [shape: f32[1,128], index: 2, kind: input, shape index: {}]   ;;  %s1590_s3 = inlined_call_operand.vmem [shape: bf16[128,256], index: 3, kind: input, shape index: {}]   ;;  %s1591_s4 = inlined_call_operand.vmem [shape: f32[1,256], index: 4, kind: input, shape index: {}]   ;;  %s1592_s5 = inlined_call_operand.hbm [shape: bf16[256,128], index: 5, kind: input, shape index: {}]   ;;  %s1593_s6 = inlined_call_operand.vmem [shape: f32[1,128], index: 6, kind: input, shape index: {}]   ;;  %s1594_s7 = inlined_call_operand.vmem [shape: bf16[128,64], index: 7, kind: input, shape index: {}]   ;;  %s1595_s8 = inlined_call_operand.vmem [shape: f32[1,64], index: 8, kind: input, shape index: {}]   ;;  %s1596_s9 = inlined_call_operand.vmem [shape: bf16[64,128], index: 9, kind: input, shape index: {}]   ;;  %s1597_s10 = inlined_call_operand.vmem [shape: bf16[12,128], index: 10, kind: input, shape index: {}]   ;;  %s1598_s11 = inlined_call_operand.vmem [shape: f32[1,128], index: 11, kind: input, shape index: {}]   ;;  %s1599_s12 = inlined_call_operand.vmem [shape: f32[32,128], index: 12, kind: output, shape index: {}]  }
   0x1 LB: > { %s334_s24 = sshll.u32 %s1592_s5, 4  ;;  %s1010_s25 = sadd.s32 4294967295, %s1326_s21   ;;  %s1326_s21 = sphi %s1396_s21, %s23_s21   ;;  %s335_s24 = int_to_ptr.hbm [resolvable:$true] %s334_s24 }
   0x2   : > { %p1012_p0 = scmp.ge.s32.totalorder %s1326_s21, 1  ;;  %p311_p1 = scmp.lt.s32.totalorder %s1326_s21, 3 }
   0x3   : > { %p1269_p2 = scmp.eq.s32.totalorder %s1010_s25, 0  ;;  %s1328_s26 = smov [#allocation2]  }
   0x4   : > { %p312_p3 = pnand %p1012_p0, %p311_p1  ;;  %s336_s27 = sshll.u32 %s1328_s26, 4  ;;  %s337_s27 = int_to_ptr.vmem [resolvable:$true] %s336_s27 }
   0x5   : > { %s1329_s28 = smov 64   ;;  %s1330_s29 = smov 4  }
   0x6   : > { %p1265_p4 = pneg %p312_p3  ;;  %379 = sbr.rel (%p312_p3) target bundleno = 731 (0x2db), region = 68 }
   0x8   : > { %p1266_p5 = pnand %p1269_p2, %p1265_p4 }
   0xa   : > { %1268 = dma.hbm_to_vmem [thread:$0]  (!%p1266_p5), %s335_s24, 2048, %s337_s27, [#allocation3], %s1329_s28, %s1329_s28, %s1330_s29  }
   0xb   : > { %1321 = dma.done.wait (%p1269_p2), [#allocation3], 2048  }
   0xc   : > { %1323 = vsyncadd (%p1269_p2), [#allocation3], 4294965248  ;;  %s1017_s30 = sshll.u32 %s1010_s25, 1  ;;  %v1027_v0 = vld [vmem:[%s1588_s1] sm:$0xf]  ;;  %vm535_vm0 = vcmask 1045504  }
   0xd   : > { %p423_p6 = scmp.lt.s32.totalorder %s1017_s30, 3  ;;  %v1215_v1 = vld [vmem:[%s1588_s1] sm:$0x30]  ;;  %v1088_v3 = vld [vmem:[%s1590_s3 + $0x70] sm:$0xf]  ;;  %vm531_vm1 = vcmask 97280  }
   0xe   : > { %v1028_v2 = vor.u32 %v1215_v1, %v1027_v0  ;;  %v1231_v4 = vld [vmem:[%s1590_s3 + $0x74] sm:$0xf0]  ;;  %v1230_v5 = vld [vmem:[%s1590_s3 + $0x74] sm:$0xf]  ;;  %v1090_v7 = vld [vmem:[%s1590_s3 + $0x78] sm:$0xf0] }
   0xf   : > { %s1601_s30 = smov (!%p423_p6, %s1017_s30), 3  ;;  %v1089_v6 = vor.u32 %v1231_v4, %v1088_v3  ;;  %v1080_v8 = vld [vmem:[%s1590_s3 + $0x60] sm:$0xf]  ;;  %v1229_v9 = vld [vmem:[%s1590_s3 + $0x64] sm:$0xf0]  ;;  %v1093_v12 = vor.u32 %v1230_v5, %v1090_v7  ;;  %v1239_v53 = vld [vmem:[#allocation2 + $0x38] sm:$0xff] }
  0x10   : > { %s1018_s13 = sshll.u32 %s1601_s30, 2  ;;  %v537_v10 = vsel %vm535_vm0, %v1028_v2, 0  ;;  %v1228_v13 = vld [vmem:[%s1590_s3 + $0x64] sm:$0xf]  ;;  %v1082_v14 = vld [vmem:[%s1590_s3 + $0x68] sm:$0xf0]  ;;  %v1081_v15 = vor.u32 %v1229_v9, %v1080_v8  ;;  %774 = vmatpush.bf16.msra.mxu3 %v1239_v53 }
  0x11   : > { %s426_s20 = scalar_lea.vmem %s1587_s0, %s1018_s13  ;;  %546 = vmatpush.bf16.msra.mxu0 %v537_v10  ;;  %641 = vmatpush.bf16.msra.mxu1 %v1089_v6  ;;  %v1085_v16 = vor.u32 %v1228_v13, %v1082_v14  ;;  %v1072_v17 = vld [vmem:[%s1590_s3 + $0x50] sm:$0xf]  ;;  %v1227_v18 = vld [vmem:[%s1590_s3 + $0x54] sm:$0xf0]  ;;  %v1226_v19 = vld [vmem:[%s1590_s3 + $0x54] sm:$0xf] }
  0x12   : > { %v1438_v11 = vld [vmem:[%s426_s20] sm:$0xff]  ;;  %655 = vmatpush.bf16.msra.mxu2 %v1093_v12  ;;  %v1074_v20 = vld [vmem:[%s1590_s3 + $0x58] sm:$0xf0]  ;;  %v1073_v21 = vor.u32 %v1227_v18, %v1072_v17  ;;  %v1225_v24 = vld [vmem:[%s1590_s3 + $0x44] sm:$0xf0]  ;;  %vm917_vm2 = vcmask 523264  }
  0x13   : > { %v1077_v22 = vor.u32 %v1226_v19, %v1074_v20  ;;  %v1064_v23 = vld [vmem:[%s1590_s3 + $0x40] sm:$0xf]  ;;  %v1224_v25 = vld [vmem:[%s1590_s3 + $0x44] sm:$0xf]  ;;  %v1066_v26 = vld [vmem:[%s1590_s3 + $0x48] sm:$0xf0] }
  0x14   : > { %1029 = vmatmul.msk.bf16.vlgmr.msra.gmra.mxu0 %vm531_vm1, %v1438_v11  ;;  %v1065_v27 = vor.u32 %v1225_v24, %v1064_v23  ;;  %v1069_v28 = vor.u32 %v1224_v25, %v1066_v26  ;;  %v1056_v29 = vld [vmem:[%s1590_s3 + $0x30] sm:$0xf]  ;;  %v1223_v30 = vld [vmem:[%s1590_s3 + $0x34] sm:$0xf0]  ;;  %v1222_v31 = vld [vmem:[%s1590_s3 + $0x34] sm:$0xf] }
  0x15   : > { %642 = vmatpush.bf16.msra.mxu1 %v1081_v15  ;;  %v1057_v32 = vor.u32 %v1223_v30, %v1056_v29  ;;  %v1058_v33 = vld [vmem:[%s1590_s3 + $0x38] sm:$0xf0]  ;;  %v1048_v35 = vld [vmem:[%s1590_s3 + $0x20] sm:$0xf]  ;;  %v1221_v36 = vld [vmem:[%s1590_s3 + $0x24] sm:$0xf0] }
  0x16   : > { %656 = vmatpush.bf16.msra.mxu2 %v1085_v16  ;;  %v1061_v34 = vor.u32 %v1222_v31, %v1058_v33  ;;  %v1220_v37 = vld [vmem:[%s1590_s3 + $0x24] sm:$0xf]  ;;  %v1049_v38 = vor.u32 %v1221_v36, %v1048_v35  ;;  %v1050_v39 = vld [vmem:[%s1590_s3 + $0x28] sm:$0xf0]  ;;  %v1040_v41 = vld [vmem:[%s1590_s3 + $0x10] sm:$0xf] }
  0x17   : > { %v1053_v40 = vor.u32 %v1220_v37, %v1050_v39  ;;  %v1219_v42 = vld [vmem:[%s1590_s3 + $0x14] sm:$0xf0]  ;;  %v1218_v43 = vld [vmem:[%s1590_s3 + $0x14] sm:$0xf]  ;;  %v1042_v45 = vld [vmem:[%s1590_s3 + $0x18] sm:$0xf0] }
  0x18   : > { %v1041_v44 = vor.u32 %v1219_v42, %v1040_v41  ;;  %v1045_v46 = vor.u32 %v1218_v43, %v1042_v45  ;;  %v1032_v47 = vld [vmem:[%s1590_s3] sm:$0xf]  ;;  %v1217_v48 = vld [vmem:[%s1590_s3 + $0x4] sm:$0xf0]  ;;  %v1216_v49 = vld [vmem:[%s1590_s3 + $0x4] sm:$0xf] }
  0x19   : > { %643 = vmatpush.bf16.msra.mxu1 %v1073_v21  ;;  %v1033_v50 = vor.u32 %v1217_v48, %v1032_v47  ;;  %v1034_v51 = vld [vmem:[%s1590_s3 + $0x8] sm:$0xf0]  ;;  %v1247_v54 = vld [vmem:[#allocation2 + $0x78] sm:$0xff]  ;;  %v1238_v55 = vld [vmem:[#allocation2 + $0x30] sm:$0xff]  ;;  %s1020_s26 = sshll.u32 %s1601_s30, 3 }
  0x1a   : > { %657 = vmatpush.bf16.msra.mxu2 %v1077_v22  ;;  %v1037_v52 = vor.u32 %v1216_v49, %v1034_v51  ;;  %788 = vmatpush.bf16.msrb.mxu0 %v1247_v54  ;;  %v1246_v56 = vld [vmem:[#allocation2 + $0x70] sm:$0xff]  ;;  %v1237_v57 = vld [vmem:[#allocation2 + $0x28] sm:$0xff]  ;;  %v1236_v59 = vld [vmem:[#allocation2 + $0x20] sm:$0xff]  ;;  %s432_s13 = scalar_lea.vmem %s1599_s12, %s1020_s26 }
  0x1b   : > { %775 = vmatpush.bf16.msra.mxu3 %v1238_v55  ;;  %v1245_v58 = vld [vmem:[#allocation2 + $0x68] sm:$0xff]  ;;  %v1282_v61 = vld [vmem:[%s1589_s2] ss:$0 sm:$0xff]  ;;  %v1235_v4 = vld [vmem:[#allocation2 + $0x18] sm:$0xff] }
  0x1c   : > { %v1244_v5 = vld [vmem:[#allocation2 + $0x60] sm:$0xff]  ;;  %v1234_v6 = vld [vmem:[#allocation2 + $0x10] sm:$0xff]  ;;  %v1243_v7 = vld [vmem:[#allocation2 + $0x58] sm:$0xff] }
  0x1d   : > { %644 = vmatpush.bf16.msra.mxu1 %v1065_v27  ;;  %v1233_v8 = vld [vmem:[#allocation2 + $0x8] sm:$0xff]  ;;  %v1242_v9 = vld [vmem:[#allocation2 + $0x50] sm:$0xff]  ;;  %v1232_v10 = vld [vmem:[#allocation2] sm:$0xff] }
  0x1e   : > { %658 = vmatpush.bf16.msra.mxu2 %v1069_v28  ;;  %789 = vmatpush.bf16.msrb.mxu0 %v1246_v56  ;;  %v1241_v12 = vld [vmem:[#allocation2 + $0x48] sm:$0xff]  ;;  %v1240_v13 = vld [vmem:[#allocation2 + $0x40] sm:$0xff]  ;;  %v1255_v14 = vld [vmem:[%s1594_s7 + $0x38] sm:$0xff] }
  0x1f   : > { %776 = vmatpush.bf16.msra.mxu3 %v1237_v57  ;;  %v1254_v15 = vld [vmem:[%s1594_s7 + $0x30] sm:$0xff]  ;;  %v1253_v16 = vld [vmem:[%s1594_s7 + $0x28] sm:$0xff]  ;;  %v1252_v17 = vld [vmem:[%s1594_s7 + $0x20] sm:$0xff] }
  0x20   : > { %v456_v18 = vld [vmem:[%s1591_s4] sm:$0x3]  ;;  %v1251_v35 = vld [vmem:[%s1594_s7 + $0x18] sm:$0xff]  ;;  %v1250_v36 = vld [vmem:[%s1594_s7 + $0x10] sm:$0xff] }
  0x21   : > { %645 = vmatpush.bf16.msra.mxu1 %v1057_v32  ;;  %v557_v20 = vperm.slane %v456_v18, 0  ;;  %v558_v24 = vperm.slane %v456_v18, 1  ;;  %v1249_v37 = vld [vmem:[%s1594_s7 + $0x8] sm:$0xff]  ;;  %v1192_v39 = vld [vmem:[%s1597_s10] sm:$0xf]  ;;  %v1259_v41 = vld [vmem:[%s1596_s9 + $0x18] sm:$0xff] }
  0x22   : > { %659 = vmatpush.bf16.msra.mxu2 %v1061_v34  ;;  %790 = vmatpush.bf16.msrb.mxu0 %v1245_v58  ;;  %v1257_v56 = vld [vmem:[%s1596_s9 + $0x8] sm:$0xff]  ;;  %v1256_v57 = vld [vmem:[%s1596_s9] sm:$0xff] }
  0x23   : > { %777 = vmatpush.bf16.msra.mxu3 %v1236_v59  ;;  %v1284_v59 = vld [vmem:[%s1595_s8] ss:$0 sm:$0xff] }
  0x25   : > { %646 = vmatpush.bf16.msra.mxu1 %v1049_v38  ;;  %v1248_v38 = vld [vmem:[%s1594_s7] sm:$0xff] }
  0x26   : > { %660 = vmatpush.bf16.msra.mxu2 %v1053_v40  ;;  %791 = vmatpush.bf16.msrb.mxu0 %v1244_v5  ;;  %v1260_v40 = vld [vmem:[%s1597_s10] sm:$0x30] }
  0x27   : > { %778 = vmatpush.bf16.msra.mxu3 %v1235_v4  ;;  %v1193_v42 = vor.u32 %v1260_v40, %v1192_v39 }
  0x29   : > { %647 = vmatpush.bf16.msra.mxu1 %v1041_v44  ;;  %v877_v43 = vsel %vm535_vm0, %v1193_v42, 0 }
  0x2a   : > { %661 = vmatpush.bf16.msra.mxu2 %v1045_v46  ;;  %792 = vmatpush.bf16.msrb.mxu0 %v1243_v7  ;;  %v1283_v46 = vld [vmem:[%s1593_s6] ss:$0 sm:$0xff] }
  0x2b   : > { %779 = vmatpush.bf16.msra.mxu3 %v1234_v6 }
  0x2d   : > { %648 = vmatpush.bf16.msra.mxu1 %v1033_v50 }
  0x2e   : > { %662 = vmatpush.bf16.msra.mxu2 %v1037_v52  ;;  %793 = vmatpush.bf16.msrb.mxu0 %v1242_v9 }
  0x2f   : > { %780 = vmatpush.bf16.msra.mxu3 %v1233_v8 }
  0x31   : > { %856 = vmatpush.bf16.msrb.mxu1 %v1255_v14 }
  0x32   : > { %794 = vmatpush.bf16.msrb.mxu0 %v1241_v12  ;;  %886 = vmatpush.bf16.msrb.mxu2 %v877_v43 }
  0x33   : > { %781 = vmatpush.bf16.msra.mxu3 %v1232_v10 }
  0x35   : > { %857 = vmatpush.bf16.msrb.mxu1 %v1254_v15 }
  0x36   : > { %795 = vmatpush.bf16.msrb.mxu0 %v1240_v13 }
  0x37   : > { %925 = vmatpush.bf16.msrb.mxu3 %v1259_v41 }
  0x39   : > { %858 = vmatpush.bf16.msrb.mxu1 %v1253_v16 }
  0x3d   : > { %859 = vmatpush.bf16.msrb.mxu1 %v1252_v17 }
  0x41   : > { %860 = vmatpush.bf16.msrb.mxu1 %v1251_v35 }
  0x45   : > { %861 = vmatpush.bf16.msrb.mxu1 %v1250_v36 }
  0x49   : > { %862 = vmatpush.bf16.msrb.mxu1 %v1249_v37 }
  0x4d   : > { %863 = vmatpush.bf16.msrb.mxu1 %v1248_v38 }
  0x91   : > { %v548_v60 = vpop.f32.mrf.mxu0 }
  0x92   : > { %v549_v62 = vadd.f32 %v1282_v61, %v548_v60 }
  0x94   : > { %v553_v1 = vmax.f32 %v549_v62, 0.0 }
  0x99   : > { %v550_v63 = vpop.f32.mrf.mxu0 }
  0x9a   : > { %v551_v0 = vadd.f32 %v1282_v61, %v550_v63 }
  0x9c   : > { %v554_v2 = vmax.f32 %v551_v0, 0.0 }
  0x9e   : > { %v555_v3 = vpack.c.bf16 %v554_v2, %v553_v1  ;;  %v1285_v1 = vld [vmem:[%s1598_s11] ss:$0 sm:$0xff] }
  0xa0   : > { %649 = vmatmul.bf16.vlgmr.msra.gmra.mxu1 %v555_v3  ;;  %663 = vmatmul.bf16.vlgmr.msra.gmra.mxu2 %v555_v3 }
  0xb0   : > { %1194 = vmatmul.msk.bf16.vlgmr.msrb.gmra.mxu2 %vm531_vm1, %v1438_v11  ;;  %v1258_v11 = vld [vmem:[%s1596_s9 + $0x10] sm:$0xff] }
  0xb1   : > { %926 = vmatpush.bf16.msrb.mxu3 %v1258_v11 }
  0xb5   : > { %927 = vmatpush.bf16.msrb.mxu3 %v1257_v56 }
  0xb9   : > { %928 = vmatpush.bf16.msrb.mxu3 %v1256_v57 }
 0x11d   : > { %v650_v19 = vpop.f32.mrf.mxu1 }
 0x11e   : > { %v651_v22 = vadd.f32 %v650_v19, %v557_v20 }
 0x120   : > { %v669_v26 = vmax.f32 %v651_v22, 0.0 }
 0x123   : > { %v664_v21 = vpop.f32.mrf.mxu2 }
 0x124   : > { %v665_v28 = vadd.f32 %v664_v21, %v558_v24 }
 0x125   : > { %v652_v23 = vpop.f32.mrf.mxu1 }
 0x126   : > { %v653_v25 = vadd.f32 %v652_v23, %v557_v20  ;;  %v670_v32 = vmax.f32 %v665_v28, 0.0 }
 0x128   : > { %v671_v27 = vmax.f32 %v653_v25, 0.0 }
 0x12a   : > { %v673_v29 = vpack.c.bf16 %v671_v27, %v669_v26 }
 0x12b   : > { %v666_v30 = vpop.f32.mrf.mxu2 }
 0x12c   : > { %v667_v31 = vadd.f32 %v666_v30, %v558_v24  ;;  %782 = vmatmul.bf16.vlgmr.msra.gmra.mxu3 %v673_v29 }
 0x12e   : > { %v672_v33 = vmax.f32 %v667_v31, 0.0 }
 0x130   : > { %v674_v34 = vpack.c.bf16 %v672_v33, %v670_v32 }
 0x132   : > { %796 = vmatmul.bf16.vlgmr.msrb.gmra.mxu0 %v674_v34 }
 0x133   : > { %v888_v0 = vpop.f32.mrf.mxu2 }
 0x13b   : > { %v890_v5 = vpop.f32.mrf.mxu2 }
 0x1af   : > { %v783_v44 = vpop.f32.mrf.mxu3  ;;  %v797_v45 = vpop.f32.mrf.mxu0 }
 0x1b0   : > { %v784_v47 = vadd.f32 %v1283_v46, %v783_v44 }
 0x1b2   : > { %v798_v49 = vadd.f32 %v797_v45, %v784_v47 }
 0x1b4   : > { %v802_v53 = vmax.f32 %v798_v49, 0.0 }
 0x1b7   : > { %v785_v48 = vpop.f32.mrf.mxu3  ;;  %v799_v51 = vpop.f32.mrf.mxu0 }
 0x1b8   : > { %v786_v50 = vadd.f32 %v1283_v46, %v785_v48 }
 0x1ba   : > { %v800_v52 = vadd.f32 %v799_v51, %v786_v50 }
 0x1bc   : > { %v803_v54 = vmax.f32 %v800_v52, 0.0 }
 0x1be   : > { %v804_v55 = vpack.c.bf16 %v803_v54, %v802_v53 }
 0x1c0   : > { %864 = vmatmul.bf16.vlgmr.msrb.gmra.mxu1 %v804_v55 }
 0x23d   : > { %v865_v58 = vpop.f32.mrf.mxu1 }
 0x23e   : > { %v866_v61 = vadd.f32 %v1284_v59, %v865_v58 }
 0x245   : > { %v867_v60 = vpop.f32.mrf.mxu1 }
 0x246   : > { %v868_v62 = vadd.f32 %v1284_v59, %v867_v60 }
 0x248   : > { %v870_v63 = vpack.c.bf16 %v868_v62, %v866_v61 }
 0x24a   : > { %1211 = vmatmul.msk.bf16.vlgmr.msrb.gmra.mxu3 %vm917_vm2, %v870_v63 }
 0x2cd   : > { %v930_v2 = vpop.f32.mrf.mxu3 }
 0x2ce   : > { %v931_v3 = vadd.f32 %v930_v2, %v888_v0 }
 0x2d0   : > { %v938_v4 = vadd.f32 %v1285_v1, %v931_v3 }
 0x2d2   : > { %940 = vst [vmem:[%s432_s13] sm:$0xff] %v938_v4 }
 0x2d5   : > { %v932_v6 = vpop.f32.mrf.mxu3 }
 0x2d6   : > { %v933_v7 = vadd.f32 %v932_v6, %v890_v5 }
 0x2d8   : > { %v939_v8 = vadd.f32 %v1285_v1, %v933_v7 }
 0x2da   : > { %941 = vst [vmem:[%s432_s13 + $0x8] sm:$0xff] %v939_v8 }
 0x2db PF: > { %s23_s21 = sadd.s32 1, %s1326_s21  }
 0x2dc   : > { %p20_p7 = scmp.ge.s32.totalorder %s23_s21, 4  }
 0x2de   :  { %22 = sbr.rel (!%p20_p7) target bundleno = 1 (0x1), region = 103 }
 0x2e3   :  { %964 = vsyncpa [#allocation3], 1 }
 0x2e4   :  { %966 = vsyncpa [#allocation3 + $0x1], 1 }

</bundles_post_ra>
